<compile_context>
chip_gen: v7x
topology: tpu7x:2x2x1
jax: 0.10.0
libtpu: 0.0.40
codegen_flags: <defaults>
</compile_context>

<pallas_src>
import jax
import jax.numpy as jnp
from jax.experimental import pallas as pl
from jax.experimental.pallas import tpu as pltpu


def mlp_kernel(x_ref,
               w1_ref, b1_ref,
               w2_ref, b2_ref,
               w3_ref, b3_ref,
               w4_ref, b4_ref,
               o_ref):
    cdt = w1_ref.dtype                      # compute dtype fed to the MXU
    h = x_ref[...]
    # Layers 1-3: matmul (MXU, f32 accumulation) + bias + ReLU (VPU).
    for w_ref, b_ref in ((w1_ref, b1_ref), (w2_ref, b2_ref), (w3_ref, b3_ref)):
        z = jnp.dot(h.astype(cdt), w_ref[...],
                    preferred_element_type=jnp.float32)
        h = jnp.maximum(z + b_ref[...], 0.0)
    # Layer 4 + sigmoid (exact: exp on the EUP, one exact divide).
    z = jnp.dot(h.astype(cdt), w4_ref[...],
                preferred_element_type=jnp.float32) + b4_ref[...]
    o_ref[...] = 1.0 / (1.0 + jnp.exp(-z))


def _choose_batch_tile(batch):
    """Prefer large tiles (MXU row fill + amortized grid-step overhead), but
    keep >= 2 grid steps when possible so v7x's two TensorCores both work."""
    if batch <= 8:
        return batch                      # one tiny tile; nothing to shard
    if batch <= 1024:
        half = -(-batch // 2)             # ceil(batch / 2)
        return -(-half // 8) * 8          # round up to a multiple of 8 sublanes
    return 512


def neuralnetwork3_forward(x, params, *, batch_tile=None,
                           compute_dtype=jnp.float32):
    """x: (B, in_dim) f32.  params: dict with w1..w4 (in, out) and b1..b4 (1, out)."""
    B, in_dim = x.shape
    w1, b1 = params["w1"], params["b1"]
    w2, b2 = params["w2"], params["b2"]
    w3, b3 = params["w3"], params["b3"]
    w4, b4 = params["w4"], params["b4"]
    d1, d2, d3, out_dim = w1.shape[1], w2.shape[1], w3.shape[1], w4.shape[1]

    if batch_tile is None:
        batch_tile = _choose_batch_tile(B)

    # Cast weights to the MXU compute dtype (no-op for f32).  x and biases stay
    # f32: biases add into the f32 accumulator; activations are cast in-kernel.
    w1c, w2c, w3c, w4c = (w.astype(compute_dtype) for w in (w1, w2, w3, w4))

    # Pad ragged batches up to a multiple of the tile; slice the result back.
    Bp = pl.cdiv(B, batch_tile) * batch_tile
    xp = x if Bp == B else jnp.pad(x, ((0, Bp - B), (0, 0)))
    grid = (Bp // batch_tile,)

    # --- cost estimate (lets XLA overlap neighbours with this small kernel) ---
    param_bytes = (sum(int(w.size) * w.dtype.itemsize
                       for w in (w1c, w2c, w3c, w4c))
                   + sum(int(b.size) * b.dtype.itemsize
                         for b in (b1, b2, b3, b4)))
    flops = 2 * B * (in_dim * d1 + d1 * d2 + d2 * d3 + d3 * out_dim)
    bytes_accessed = (int(xp.size) * xp.dtype.itemsize + param_bytes
                      + B * out_dim * 4)
    cost = pl.CostEstimate(flops=flops, transcendentals=B * out_dim,
                           bytes_accessed=bytes_accessed)

    # --- VMEM budget: double-buffered x/out tiles + resident params + live
    #     f32 activations, with generous headroom (v7x only has 64 MiB). ---
    io_vmem = 2 * batch_tile * (in_dim * xp.dtype.itemsize + out_dim * 4)
    act_vmem = 3 * batch_tile * max(d1, d2, d3, out_dim) * 4
    vmem_limit = int(min(max(2 * (2 * param_bytes + io_vmem + act_vmem)
                             + (4 << 20),
                             16 << 20),
                         96 << 20))

    def resident(a):
        # Constant index_map -> same block every step: the pipeline keeps the
        # operand resident in VMEM instead of re-DMAing it per grid step.
        return pl.BlockSpec(a.shape, lambda i: (0, 0))

    out = pl.pallas_call(
        mlp_kernel,
        out_shape=jax.ShapeDtypeStruct((Bp, out_dim), jnp.float32),
        grid_spec=pltpu.PrefetchScalarGridSpec(
            num_scalar_prefetch=0,
            grid=grid,
            in_specs=[
                pl.BlockSpec((batch_tile, in_dim), lambda i: (i, 0)),  # x tile
                resident(w1c), resident(b1),
                resident(w2c), resident(b2),
                resident(w3c), resident(b3),
                resident(w4c), resident(b4),
            ],
            out_specs=pl.BlockSpec((batch_tile, out_dim), lambda i: (i, 0)),
        ),
        compiler_params=pltpu.CompilerParams(
            dimension_semantics=("parallel",),
            vmem_limit_bytes=vmem_limit),
        cost_estimate=cost,
    )(xp, w1c, b1, w2c, b2, w3c, b3, w4c, b4)

    return out[:B]


def init_params(key, in_dim, n_hidden, out_dim):
    """Deterministic init mimicking nn.Linear default (uniform +-1/sqrt(fan_in)),
    with weights stored transposed as (in, out)."""
    dims = [(in_dim, 4 * n_hidden),
            (4 * n_hidden, 2 * n_hidden),
            (2 * n_hidden, n_hidden),
            (n_hidden, out_dim)]
    params = {}
    for li, (fan_in, fan_out) in enumerate(dims, start=1):
        key, kw, kb = jax.random.split(key, 3)
        bound = 1.0 / jnp.sqrt(fan_in)
        params[f"w{li}"] = jax.random.uniform(
            kw, (fan_in, fan_out), jnp.float32, minval=-bound, maxval=bound)
        params[f"b{li}"] = jax.random.uniform(
            kb, (1, fan_out), jnp.float32, minval=-bound, maxval=bound)
    return params


def reference_forward(x, params):
    h = jnp.maximum(x @ params["w1"] + params["b1"], 0.0)
    h = jnp.maximum(h @ params["w2"] + params["b2"], 0.0)
    h = jnp.maximum(h @ params["w3"] + params["b3"], 0.0)
    return jax.nn.sigmoid(h @ params["w4"] + params["b4"])


if __name__ == "__main__":
    key = jax.random.PRNGKey(0)
    in_dim, n_hidden, out_dim = 16, 32, 8   # hidden widths: 128 -> 64 -> 32
    batch = 16

    kx, kp = jax.random.split(key)
    x = jax.random.normal(kx, (batch, in_dim), dtype=jnp.float32)
    params = init_params(kp, in_dim, n_hidden, out_dim)

    ref = reference_forward(x, params)

    # f32 MXU path: everything in the kernel is now exact, so only matmul
    # rounding-mode differences vs. the XLA reference remain.
    out_f32 = jax.block_until_ready(
        neuralnetwork3_forward(x, params, compute_dtype=jnp.float32))
    assert out_f32.shape == (batch, out_dim)
    assert bool(jnp.allclose(out_f32, ref, atol=1e-2, rtol=1e-2))

    print("KERNEL_OK")
</pallas_src>

<mosaic_0001>
module attributes {stable_mosaic.version = 11 : i64} {
  func.func @mlp_kernel(%arg0: i32, %arg1: memref<8x16xf32, #tpu.memory_space<vmem>>, %arg2: memref<16x128xf32, #tpu.memory_space<vmem>>, %arg3: memref<1x128xf32, #tpu.memory_space<vmem>>, %arg4: memref<128x64xf32, #tpu.memory_space<vmem>>, %arg5: memref<1x64xf32, #tpu.memory_space<vmem>>, %arg6: memref<64x32xf32, #tpu.memory_space<vmem>>, %arg7: memref<1x32xf32, #tpu.memory_space<vmem>>, %arg8: memref<32x8xf32, #tpu.memory_space<vmem>>, %arg9: memref<1x8xf32, #tpu.memory_space<vmem>>, %arg10: memref<8x8xf32, #tpu.memory_space<vmem>>) attributes {dimension_semantics = [#tpu.dimension_semantics<parallel>], iteration_bounds = array<i64: 2>, scalar_prefetch = 0 : i64, scratch_operands = 0 : i64, tpu.core_type = #tpu.core_type<tc>, window_params = [{transform_indices = @transform_0, window_bounds = array<i64: 8, 16>}, {pipeline_mode = #tpu.pipeline_mode<synchronous>, transform_indices = @transform_1, window_bounds = array<i64: 16, 128>}, {pipeline_mode = #tpu.pipeline_mode<synchronous>, transform_indices = @transform_2, window_bounds = array<i64: 1, 128>}, {pipeline_mode = #tpu.pipeline_mode<synchronous>, transform_indices = @transform_3, window_bounds = array<i64: 128, 64>}, {pipeline_mode = #tpu.pipeline_mode<synchronous>, transform_indices = @transform_4, window_bounds = array<i64: 1, 64>}, {pipeline_mode = #tpu.pipeline_mode<synchronous>, transform_indices = @transform_5, window_bounds = array<i64: 64, 32>}, {pipeline_mode = #tpu.pipeline_mode<synchronous>, transform_indices = @transform_6, window_bounds = array<i64: 1, 32>}, {pipeline_mode = #tpu.pipeline_mode<synchronous>, transform_indices = @transform_7, window_bounds = array<i64: 32, 8>}, {pipeline_mode = #tpu.pipeline_mode<synchronous>, transform_indices = @transform_8, window_bounds = array<i64: 1, 8>}, {transform_indices = @transform_9, window_bounds = array<i64: 8, 8>}]} {
    %c0 = arith.constant 0 : index
    %c0_0 = arith.constant 0 : index
    %0 = vector.load %arg1[%c0, %c0_0] : memref<8x16xf32, #tpu.memory_space<vmem>>, vector<8x16xf32>
    %c0_1 = arith.constant 0 : index
    %c0_2 = arith.constant 0 : index
    %1 = vector.load %arg2[%c0_1, %c0_2] : memref<16x128xf32, #tpu.memory_space<vmem>>, vector<16x128xf32>
    %cst = arith.constant dense<0.000000e+00> : vector<8x128xf32>
    %2 = tpu.matmul %0, %1, %cst {dimension_numbers = #tpu.dot_dimension_numbers<[1], [0], [0], [1], [0, 0, 1, 1], [], []>} : vector<8x16xf32>, vector<16x128xf32>, vector<8x128xf32> -> vector<8x128xf32>
    %c0_3 = arith.constant 0 : index
    %c0_4 = arith.constant 0 : index
    %3 = vector.load %arg3[%c0_3, %c0_4] : memref<1x128xf32, #tpu.memory_space<vmem>>, vector<1x128xf32>
    %4 = vector.broadcast %3 : vector<1x128xf32> to vector<8x128xf32>
    %5 = arith.addf %2, %4 : vector<8x128xf32>
    %cst_5 = arith.constant 0.000000e+00 : f32
    %6 = vector.broadcast %cst_5 : f32 to vector<8x128xf32>
    %7 = arith.maximumf %5, %6 : vector<8x128xf32>
    %c0_6 = arith.constant 0 : index
    %c0_7 = arith.constant 0 : index
    %8 = vector.load %arg4[%c0_6, %c0_7] : memref<128x64xf32, #tpu.memory_space<vmem>>, vector<128x64xf32>
    %cst_8 = arith.constant dense<0.000000e+00> : vector<8x64xf32>
    %9 = tpu.matmul %7, %8, %cst_8 {dimension_numbers = #tpu.dot_dimension_numbers<[1], [0], [0], [1], [0, 0, 1, 1], [], []>} : vector<8x128xf32>, vector<128x64xf32>, vector<8x64xf32> -> vector<8x64xf32>
    %c0_9 = arith.constant 0 : index
    %c0_10 = arith.constant 0 : index
    %10 = vector.load %arg5[%c0_9, %c0_10] : memref<1x64xf32, #tpu.memory_space<vmem>>, vector<1x64xf32>
    %11 = vector.broadcast %10 : vector<1x64xf32> to vector<8x64xf32>
    %12 = arith.addf %9, %11 : vector<8x64xf32>
    %cst_11 = arith.constant 0.000000e+00 : f32
    %13 = vector.broadcast %cst_11 : f32 to vector<8x64xf32>
    %14 = arith.maximumf %12, %13 : vector<8x64xf32>
    %c0_12 = arith.constant 0 : index
    %c0_13 = arith.constant 0 : index
    %15 = vector.load %arg6[%c0_12, %c0_13] : memref<64x32xf32, #tpu.memory_space<vmem>>, vector<64x32xf32>
    %cst_14 = arith.constant dense<0.000000e+00> : vector<8x32xf32>
    %16 = tpu.matmul %14, %15, %cst_14 {dimension_numbers = #tpu.dot_dimension_numbers<[1], [0], [0], [1], [0, 0, 1, 1], [], []>} : vector<8x64xf32>, vector<64x32xf32>, vector<8x32xf32> -> vector<8x32xf32>
    %c0_15 = arith.constant 0 : index
    %c0_16 = arith.constant 0 : index
    %17 = vector.load %arg7[%c0_15, %c0_16] : memref<1x32xf32, #tpu.memory_space<vmem>>, vector<1x32xf32>
    %18 = vector.broadcast %17 : vector<1x32xf32> to vector<8x32xf32>
    %19 = arith.addf %16, %18 : vector<8x32xf32>
    %cst_17 = arith.constant 0.000000e+00 : f32
    %20 = vector.broadcast %cst_17 : f32 to vector<8x32xf32>
    %21 = arith.maximumf %19, %20 : vector<8x32xf32>
    %c0_18 = arith.constant 0 : index
    %c0_19 = arith.constant 0 : index
    %22 = vector.load %arg8[%c0_18, %c0_19] : memref<32x8xf32, #tpu.memory_space<vmem>>, vector<32x8xf32>
    %cst_20 = arith.constant dense<0.000000e+00> : vector<8x8xf32>
    %23 = tpu.matmul %21, %22, %cst_20 {dimension_numbers = #tpu.dot_dimension_numbers<[1], [0], [0], [1], [0, 0, 1, 1], [], []>} : vector<8x32xf32>, vector<32x8xf32>, vector<8x8xf32> -> vector<8x8xf32>
    %c0_21 = arith.constant 0 : index
    %c0_22 = arith.constant 0 : index
    %24 = vector.load %arg9[%c0_21, %c0_22] : memref<1x8xf32, #tpu.memory_space<vmem>>, vector<1x8xf32>
    %25 = vector.broadcast %24 : vector<1x8xf32> to vector<8x8xf32>
    %26 = arith.addf %23, %25 : vector<8x8xf32>
    %cst_23 = arith.constant 0.000000e+00 : f32
    %27 = vector.broadcast %cst_23 : f32 to vector<8x8xf32>
    %28 = arith.subf %27, %26 : vector<8x8xf32>
    %29 = math.exp %28 : vector<8x8xf32>
    %cst_24 = arith.constant 1.000000e+00 : f32
    %30 = vector.broadcast %cst_24 : f32 to vector<8x8xf32>
    %31 = arith.addf %30, %29 : vector<8x8xf32>
    %cst_25 = arith.constant 1.000000e+00 : f32
    %32 = vector.broadcast %cst_25 : f32 to vector<8x8xf32>
    %33 = arith.divf %32, %31 : vector<8x8xf32>
    %c0_26 = arith.constant 0 : index
    %c0_27 = arith.constant 0 : index
    %34 = vector.load %arg10[%c0_26, %c0_27] : memref<8x8xf32, #tpu.memory_space<vmem>>, vector<8x8xf32>
    tpu.vector_store %arg10[%c0_26, %c0_27], %33 {strides = array<i32>} : memref<8x8xf32, #tpu.memory_space<vmem>>, vector<8x8xf32>,
    return
  }
  func.func @transform_0(%arg0: i32) -> (i32, i32) {
    %c0_i32 = arith.constant 0 : i32
    %c0_i32_0 = arith.constant 0 : i32
    return %arg0, %c0_i32 : i32, i32
  }
  func.func @transform_1(%arg0: i32) -> (i32, i32) {
    %c0_i32 = arith.constant 0 : i32
    %c0_i32_0 = arith.constant 0 : i32
    %c0_i32_1 = arith.constant 0 : i32
    return %c0_i32, %c0_i32_0 : i32, i32
  }
  func.func @transform_2(%arg0: i32) -> (i32, i32) {
    %c0_i32 = arith.constant 0 : i32
    %c0_i32_0 = arith.constant 0 : i32
    %c0_i32_1 = arith.constant 0 : i32
    return %c0_i32, %c0_i32_0 : i32, i32
  }
  func.func @transform_3(%arg0: i32) -> (i32, i32) {
    %c0_i32 = arith.constant 0 : i32
    %c0_i32_0 = arith.constant 0 : i32
    %c0_i32_1 = arith.constant 0 : i32
    return %c0_i32, %c0_i32_0 : i32, i32
  }
  func.func @transform_4(%arg0: i32) -> (i32, i32) {
    %c0_i32 = arith.constant 0 : i32
    %c0_i32_0 = arith.constant 0 : i32
    %c0_i32_1 = arith.constant 0 : i32
    return %c0_i32, %c0_i32_0 : i32, i32
  }
  func.func @transform_5(%arg0: i32) -> (i32, i32) {
    %c0_i32 = arith.constant 0 : i32
    %c0_i32_0 = arith.constant 0 : i32
    %c0_i32_1 = arith.constant 0 : i32
    return %c0_i32, %c0_i32_0 : i32, i32
  }
  func.func @transform_6(%arg0: i32) -> (i32, i32) {
    %c0_i32 = arith.constant 0 : i32
    %c0_i32_0 = arith.constant 0 : i32
    %c0_i32_1 = arith.constant 0 : i32
    return %c0_i32, %c0_i32_0 : i32, i32
  }
  func.func @transform_7(%arg0: i32) -> (i32, i32) {
    %c0_i32 = arith.constant 0 : i32
    %c0_i32_0 = arith.constant 0 : i32
    %c0_i32_1 = arith.constant 0 : i32
    return %c0_i32, %c0_i32_0 : i32, i32
  }
  func.func @transform_8(%arg0: i32) -> (i32, i32) {
    %c0_i32 = arith.constant 0 : i32
    %c0_i32_0 = arith.constant 0 : i32
    %c0_i32_1 = arith.constant 0 : i32
    return %c0_i32, %c0_i32_0 : i32, i32
  }
  func.func @transform_9(%arg0: i32) -> (i32, i32) {
    %c0_i32 = arith.constant 0 : i32
    %c0_i32_0 = arith.constant 0 : i32
    return %arg0, %c0_i32 : i32, i32
  }
}

</mosaic_0001>

<bundles_post_ra>
// kernel: tpu_custom_call.1
= control target key start
LH: loop header
LB: loop body
LE: loop exit
PB: predicated region body
PF: predicated region fallthrough
CT: control target
= control target key end

     0   :  { %s986_s30 = smov 0   ;;  %s1135_s0 = inlined_call_operand.vmem [shape: f32[16,16], index: 0, kind: input, shape index: {}]   ;;  %s1136_s1 = inlined_call_operand.vmem [shape: f32[16,128], index: 1, kind: input, shape index: {}]   ;;  %s1137_s2 = inlined_call_operand.vmem [shape: f32[1,128], index: 2, kind: input, shape index: {}]   ;;  %s1138_s3 = inlined_call_operand.vmem [shape: f32[128,64], index: 3, kind: input, shape index: {}]   ;;  %s1139_s4 = inlined_call_operand.vmem [shape: f32[1,64], index: 4, kind: input, shape index: {}]   ;;  %s1140_s5 = inlined_call_operand.vmem [shape: f32[64,32], index: 5, kind: input, shape index: {}]   ;;  %s1141_s6 = inlined_call_operand.vmem [shape: f32[1,32], index: 6, kind: input, shape index: {}]   ;;  %s1142_s7 = inlined_call_operand.vmem [shape: f32[32,8], index: 7, kind: input, shape index: {}]   ;;  %s1143_s8 = inlined_call_operand.vmem [shape: f32[1,8], index: 8, kind: input, shape index: {}]   ;;  %s1144_s9 = inlined_call_operand.vmem [shape: f32[16,8], index: 9, kind: output, shape index: {}]  }
   0x1 LB: > { %s743_s10 = sadd.s32 4294967295, %s931_s30   ;;  %p747_p0 = scmp.ge.s32.totalorder %s931_s30, 1  ;;  %s931_s30 = sphi %s986_s30, %s19_s30  }
   0x2   : > { %p286_p1 = scmp.lt.s32.totalorder %s931_s30, 3 }
   0x4   : > { %p287_p2 = pnand %p747_p0, %p286_p1 }
   0x5   : > { %v329_v0 = vld [vmem:[%s1136_s1] sm:$0xff] (!%p287_p2)  ;;  %v330_v1 = vld [vmem:[%s1136_s1 + $0x8] sm:$0xff] (!%p287_p2)  ;;  %p320_p3 = scmp.lt.s32.totalorder (!%p287_p2), %s743_s10, 1  ;;  %v933_v2 = vmov (!%p287_p2), 0.0|0.0   ;;  %vm934_vm0 = vmmov (!%p287_p2), 0   ;;  %v935_v4 = vmov (!%p287_p2), 0.0  }
   0x6   : > { %290 = sbr.rel (%p287_p2) target bundleno = 908 (0x38c), region = 56  ;;  %865 = vmatprep.subr.bf16.mxu0 (!%p287_p2), %v933_v2  ;;  %v866_v3 = vpack.c.bf16 (!%p287_p2), %v330_v1, %v329_v0  ;;  %797 = vmatprep.mubr.msk.f32.mxu0 (!%p287_p2), %vm934_vm0, %v935_v4  ;;  %v413_v5 = vld [vmem:[%s1138_s3] sm:$0xff] (!%p287_p2)  ;;  %v414_v6 = vld [vmem:[%s1138_s3 + $0x8] sm:$0xff] (!%p287_p2)  ;;  %v415_v7 = vld [vmem:[%s1138_s3 + $0x10] sm:$0xff] (!%p287_p2)  ;;  %vm338_vm1 = vcmask (!%p287_p2), 130048   ;;  %vm522_vm2 = vcmask (!%p287_p2), 523264  }
   0x7   : > { %868 = vmatprep.subr.bf16.mxu1 (!%p287_p2), %v933_v2  ;;  %v869_v8 = vpack.c.bf16 (!%p287_p2), %v414_v6, %v413_v5  ;;  %v416_v9 = vld [vmem:[%s1138_s3 + $0x18] sm:$0xff] (!%p287_p2)  ;;  %832 = vmatprep.mubr.msk.f32.mxu1 (!%p287_p2), %vm934_vm0, %v935_v4  ;;  %v417_v11 = vld [vmem:[%s1138_s3 + $0x20] sm:$0xff] (!%p287_p2)  ;;  %v418_v12 = vld [vmem:[%s1138_s3 + $0x28] sm:$0xff] (!%p287_p2)  ;;  %vm608_vm3 = vcmask (!%p287_p2), 261120   ;;  %vm688_vm4 = vcmask (!%p287_p2), 64512  }
   0x8   : > { %867 = vmatpush3.bf16.msra.mxu0 (!%p287_p2), %v866_v3  ;;  %v872_v10 = vpack.c.bf16 (!%p287_p2), %v416_v9, %v415_v7  ;;  %v875_v14 = vpack.c.bf16 (!%p287_p2), %v418_v12, %v417_v11  ;;  %v419_v15 = vld [vmem:[%s1138_s3 + $0x30] sm:$0xff] (!%p287_p2)  ;;  %v420_v16 = vld [vmem:[%s1138_s3 + $0x38] sm:$0xff] (!%p287_p2)  ;;  %v421_v18 = vld [vmem:[%s1138_s3 + $0x40] sm:$0xff] (!%p287_p2) }
   0x9   : > { %870 = vmatpush3.bf16.msra.mxu1 (!%p287_p2), %v869_v8  ;;  %892 = vmatprep.subr.bf16.mxu0 (!%p287_p2), %v933_v2  ;;  %v878_v17 = vpack.c.bf16 (!%p287_p2), %v420_v16, %v419_v15  ;;  %v422_v19 = vld [vmem:[%s1138_s3 + $0x48] sm:$0xff] (!%p287_p2)  ;;  %v423_v21 = vld [vmem:[%s1138_s3 + $0x50] sm:$0xff] (!%p287_p2)  ;;  %v424_v22 = vld [vmem:[%s1138_s3 + $0x58] sm:$0xff] (!%p287_p2) }
   0xa   : > { %871 = vmatprep.subr.bf16.mxu1 (!%p287_p2), %v933_v2  ;;  %v881_v20 = vpack.c.bf16 (!%p287_p2), %v422_v19, %v421_v18  ;;  %v884_v23 = vpack.c.bf16 (!%p287_p2), %v424_v22, %v423_v21  ;;  %v425_v24 = vld [vmem:[%s1138_s3 + $0x60] sm:$0xff] (!%p287_p2)  ;;  %v426_v25 = vld [vmem:[%s1138_s3 + $0x68] sm:$0xff] (!%p287_p2)  ;;  %v427_v27 = vld [vmem:[%s1138_s3 + $0x70] sm:$0xff] (!%p287_p2) }
   0xb   : > { %v887_v26 = vpack.c.bf16 (!%p287_p2), %v426_v25, %v425_v24  ;;  %v428_v28 = vld [vmem:[%s1138_s3 + $0x78] sm:$0xff] (!%p287_p2)  ;;  %v507_v30 = vld [vmem:[%s1140_s5] sm:$0xff] (!%p287_p2)  ;;  %v508_v31 = vld [vmem:[%s1140_s5 + $0x8] sm:$0xff] (!%p287_p2) }
   0xc   : > { %v890_v29 = vpack.c.bf16 (!%p287_p2), %v428_v28, %v427_v27  ;;  %v509_v32 = vld [vmem:[%s1140_s5 + $0x10] sm:$0xff] (!%p287_p2)  ;;  %v893_v33 = vpack.c.bf16 (!%p287_p2), %v508_v31, %v507_v30  ;;  %v510_v34 = vld [vmem:[%s1140_s5 + $0x18] sm:$0xff] (!%p287_p2)  ;;  %v511_v36 = vld [vmem:[%s1140_s5 + $0x20] sm:$0xff] (!%p287_p2) }
   0xd   : > { %s1146_s10 = smov (!%p320_p3, %s743_s10), 1  ;;  %873 = vmatpush3.bf16.msra.mxu1 %v872_v10  ;;  %v896_v35 = vpack.c.bf16 %v510_v34, %v509_v32  ;;  %v512_v37 = vld [vmem:[%s1140_s5 + $0x28] sm:$0xff]  ;;  %v750_v39 = vld [vmem:[%s1137_s2] ss:$0 sm:$0xff]  ;;  %v513_v44 = vld [vmem:[%s1140_s5 + $0x30] sm:$0xff] }
   0xe   : > { %s748_s23 = sshll.u32 %s1146_s10, 3  ;;  %874 = vmatprep.subr.bf16.mxu1 %v933_v2  ;;  %v899_v38 = vpack.c.bf16 %v512_v37, %v511_v36  ;;  %v514_v45 = vld [vmem:[%s1140_s5 + $0x38] sm:$0xff]  ;;  %v752_v47 = vld [vmem:[%s1139_s4] ss:$0 sm:$0xff]  ;;  %v598_v49 = vld [vmem:[%s1142_s7 + $0x8] sm:$0xff] }
   0xf   : > { %s323_s26 = scalar_lea.vmem %s1135_s0, %s748_s23  ;;  %v902_v46 = vpack.c.bf16 %v514_v45, %v513_v44  ;;  %v597_v48 = vld [vmem:[%s1142_s7] sm:$0xff]  ;;  %v599_v55 = vld [vmem:[%s1142_s7 + $0x10] sm:$0xff]  ;;  %v600_v56 = vld [vmem:[%s1142_s7 + $0x18] sm:$0xff]  ;;  %s327_s12 = scalar_lea.vmem %s1144_s9, %s748_s23 }
  0x10   : > { %v328_v13 = vld [vmem:[%s323_s26] sm:$0xff]  ;;  %v905_v53 = vpack.c.bf16 %v598_v49, %v597_v48  ;;  %v908_v57 = vpack.c.bf16 %v600_v56, %v599_v55 }
  0x11   : > { %798 = vmatmul.mubr.msk.f32.vlgmr.msra.gmra.mrb[0].mxu0 %vm338_vm1, %v328_v13  ;;  %876 = vmatpush3.bf16.msra.mxu1 %v875_v14  ;;  %v753_v58 = vld [vmem:[%s1141_s6] ss:$0 sm:$0xff] }
  0x12   : > { %851 = vmatprep.mubr.msk.f32.mxu0 %vm934_vm0, %v935_v4  ;;  %877 = vmatprep.subr.bf16.mxu1 %v933_v2  ;;  %v755_v63 = vld [vmem:[%s1143_s8] ss:$0 sm:$0xff] }
  0x13   : > { %894 = vmatpush3.bf16.msra.mxu0 %v893_v33 }
  0x14   : > { %895 = vmatprep.subr.bf16.mxu0 %v933_v2 }
  0x15   : > { %879 = vmatpush3.bf16.msra.mxu1 %v878_v17 }
  0x16   : > { %880 = vmatprep.subr.bf16.mxu1 %v933_v2 }
  0x17   : > { %897 = vmatpush3.bf16.msra.mxu0 %v896_v35 }
  0x18   : > { %898 = vmatprep.subr.bf16.mxu0 %v933_v2 }
  0x19   : > { %882 = vmatpush3.bf16.msra.mxu1 %v881_v20 }
  0x1a   : > { %883 = vmatprep.subr.bf16.mxu1 %v933_v2 }
  0x1b   : > { %900 = vmatpush3.bf16.msra.mxu0 %v899_v38 }
  0x1c   : > { %901 = vmatprep.subr.bf16.mxu0 %v933_v2 }
  0x1d   : > { %885 = vmatpush3.bf16.msra.mxu1 %v884_v23 }
  0x1e   : > { %886 = vmatprep.subr.bf16.mxu1 %v933_v2 }
  0x1f   : > { %903 = vmatpush3.bf16.msra.mxu0 %v902_v46 }
  0x20   : > { %904 = vmatprep.subr.bf16.mxu0 %v933_v2 }
  0x21   : > { %888 = vmatpush3.bf16.msra.mxu1 %v887_v26 }
  0x22   : > { %889 = vmatprep.subr.bf16.mxu1 %v933_v2 }
  0x25   : > { %891 = vmatpush3.bf16.msra.mxu1 %v890_v29 }
  0xe4   : > { %v408_v40 = vpop.f32.mrb[0].mxu0 }
  0xe5   : > { %v409_v41 = vadd.f32 %v750_v39, %v408_v40  ;;  %v799_v42 = vpop.f32.mrb[1].mxu0 }
  0xe7   : > { %v412_v43 = vmax.f32 %v409_v41, 0.0 }
  0xe9   : > { %833 = vmatmul.mubr.f32.vlgmr.msra.gmra.mrb[0].mxu1 %v412_v43 }
 0x1bc   : > { %v502_v50 = vpop.f32.mrb[0].mxu1 }
 0x1bd   : > { %v503_v51 = vadd.f32 %v752_v47, %v502_v50  ;;  %v834_v52 = vpop.f32.mrb[1].mxu1 }
 0x1bf   : > { %v506_v54 = vmax.f32 %v503_v51, 0.0 }
 0x1c1   : > { %852 = vmatmul.mubr.msk.f32.vlgmr.msra.gmra.mrb[2].mxu0 %vm522_vm2, %v506_v54 }
 0x1c2   : > { %906 = vmatpush3.bf16.msra.mxu0 %v905_v53  ;;  %862 = vmatprep.mubr.msk.f32.mxu0 %vm934_vm0, %v935_v4 }
 0x1c3   : > { %907 = vmatprep.subr.bf16.mxu0 %v933_v2 }
 0x1c6   : > { %909 = vmatpush3.bf16.msra.mxu0 %v908_v57 }
 0x294   : > { %v592_v59 = vpop.f32.mrb[2].mxu0 }
 0x295   : > { %v593_v60 = vadd.f32 %v753_v58, %v592_v59  ;;  %v853_v61 = vpop.f32.mrb[3].mxu0 }
 0x297   : > { %v596_v62 = vmax.f32 %v593_v60, 0.0 }
 0x299   : > { %863 = vmatmul.mubr.msk.f32.vlgmr.msra.gmra.mrb[4].mxu0 %vm608_vm3, %v596_v62 }
 0x36c   : > { %v678_v0 = vpop.f32.mrb[4].mxu0 }
 0x36d   : > { %v679_v1 = vadd.f32 %v755_v63, %v678_v0  ;;  %v864_v2 = vpop.f32.mrb[5].mxu0 }
 0x36f   : > { %v682_v3 = vsub.f32 0.0, %v679_v1 }
 0x371   : > { %v683_v4 = vmul.f32 1.442695, %v682_v3 }
 0x373   : > { %921 = vpow2.f32 %v683_v4 }
 0x37d   : > { %v922_v5 = vpop.eup %921 }
 0x37e   : > { %v685_v6 = vadd.f32 1.0, %v922_v5 }
 0x380   : > { %923 = vrcp.f32 %v685_v6 }
 0x38a   : > { %v924_v7 = vpop.eup %923 }
 0x38b   : > { %689 = vst.msk [vmem:[%s327_s12] sm:$0xff] %vm688_vm4, %v924_v7 }
 0x38c PF: > { %s19_s30 = sadd.s32 1, %s931_s30  }
 0x38d   : > { %p16_p4 = scmp.ge.s32.totalorder %s19_s30, 4  }
 0x38f   :  { %18 = sbr.rel (!%p16_p4) target bundleno = 1 (0x1), region = 86 }

</bundles_post_ra>
